<compile_context>
chip_gen: v5e
topology: v5e:2x2
jax: 0.10.0
libtpu: 0.0.40
codegen_flags: <defaults>
</compile_context>

<pallas_src>
import functools

import jax
import jax.numpy as jnp
from jax.experimental import pallas as pl
from jax.experimental.pallas import tpu as pltpu


def _detect_vmem_limit():
    try:
        kind = jax.devices()[0].device_kind.lower()
    except Exception:
        return 48 * 1024 * 1024
    if "v7" in kind or "tpu7" in kind:
        return 48 * 1024 * 1024          # v7x: 64 MiB physical VMEM per TC
    return 64 * 1024 * 1024              # v5e / v6e: 128 MiB physical VMEM


_VMEM_LIMIT = _detect_vmem_limit()


def _round_up(x, m):
    return ((x + m - 1) // m) * m


def _fit_tile(dim, target, align):
    """Largest tile <= target that divides `dim` and is `align`-aligned, else full dim."""
    if dim <= target:
        return dim
    t = (target // align) * align
    while t >= align:
        if dim % t == 0:
            return t
        t -= align
    return dim


def _pad_rows(a, m_pad):
    if a.shape[0] == m_pad:
        return a
    return jnp.pad(a, ((0, m_pad - a.shape[0]), (0, 0)))


# ---------------- Fused (LayerNorm) + matmul (+bias +GELU +residual) ----------------

def _linear_kernel(*refs, has_ln, has_bias, has_residual, activation, eps):
    it = iter(refs)
    x_ref = next(it)
    g_ref = next(it) if has_ln else None
    b_ref = next(it) if has_ln else None
    w_ref = next(it)
    bias_ref = next(it) if has_bias else None
    res_ref = next(it) if has_residual else None
    o_ref = next(it)

    if has_ln:
        # LayerNorm fused into the matmul prologue (f32), then cast to bf16 for the MXU.
        xf = x_ref[...].astype(jnp.float32)
        mean = jnp.mean(xf, axis=-1, keepdims=True)
        xc = xf - mean
        var = jnp.mean(xc * xc, axis=-1, keepdims=True)
        xf = xc * jax.lax.rsqrt(var + eps) * g_ref[...] + b_ref[...]
        x_mxu = xf.astype(jnp.bfloat16)
    else:
        x_mxu = x_ref[...]                                   # already bf16

    out = jnp.dot(x_mxu, w_ref[...], preferred_element_type=jnp.float32)

    if has_bias:                                             # bias added exactly once
        out = out + bias_ref[...]
    if activation == "gelu":
        out = 0.5 * out * (1.0 + jnp.tanh(
            0.7978845608028654 * (out + 0.044715 * out * out * out)))
    if has_residual:                                         # fused residual add
        out = out + res_ref[...].astype(jnp.float32)
    o_ref[...] = out.astype(o_ref.dtype)


def pallas_linear(x, w, *, ln=None, bias=None, residual=None, activation=None,
                  out_dtype=jnp.float32, tm=512, tn=256, eps=1e-5):
    """out = act(ln(x) @ w + bias) + residual, tiled over (M, Nout), full-K blocks."""
    M, K = x.shape
    K2, Nout = w.shape
    assert K == K2

    tm_eff = min(tm, _round_up(M, 8))          # multiple of 8 (sublane tile)
    m_pad = _round_up(M, tm_eff)               # pad M instead of full-M fallback
    tn_eff = _fit_tile(Nout, tn, 128)

    args = [_pad_rows(x, m_pad)]
    in_specs = [pl.BlockSpec((tm_eff, K), lambda i, j: (i, 0))]
    if ln is not None:
        gamma, beta = ln
        args += [gamma, beta]
        in_specs += [pl.BlockSpec((1, K), lambda i, j: (0, 0)),
                     pl.BlockSpec((1, K), lambda i, j: (0, 0))]
    args.append(w)
    in_specs.append(pl.BlockSpec((K, tn_eff), lambda i, j: (0, j)))
    if bias is not None:
        args.append(bias)
        in_specs.append(pl.BlockSpec((1, tn_eff), lambda i, j: (0, j)))
    if residual is not None:
        args.append(_pad_rows(residual, m_pad))
        in_specs.append(pl.BlockSpec((tm_eff, tn_eff), lambda i, j: (i, j)))

    kernel = functools.partial(
        _linear_kernel,
        has_ln=ln is not None,
        has_bias=bias is not None,
        has_residual=residual is not None,
        activation=activation,
        eps=eps,
    )
    out = pl.pallas_call(
        kernel,
        out_shape=jax.ShapeDtypeStruct((m_pad, Nout), out_dtype),
        grid_spec=pltpu.PrefetchScalarGridSpec(
            num_scalar_prefetch=0,
            grid=(m_pad // tm_eff, Nout // tn_eff),
            in_specs=in_specs,
            out_specs=pl.BlockSpec((tm_eff, tn_eff), lambda i, j: (i, j)),
        ),
        compiler_params=pltpu.CompilerParams(
            dimension_semantics=("parallel", "parallel"),
            vmem_limit_bytes=_VMEM_LIMIT,
        ),
    )(*args)
    if m_pad != M:
        out = out[:M]
    return out


# ------------------------------- Attention kernels ----------------------------------

def _attention_group_kernel(q_ref, k_ref, v_ref, o_ref, *, heads_per_group, head_dim):
    # q/k/v/o refs: (1, N, G) bf16, G = heads_per_group * head_dim (128-lane dense).
    # The attention scale is pre-folded into the qkv weight's q columns.
    outs = []
    for h in range(heads_per_group):
        lo = h * head_dim
        hi = lo + head_dim
        q = q_ref[0, :, lo:hi]                                         # (N, D) bf16
        k = k_ref[0, :, lo:hi]                                         # (N, D) bf16
        v = v_ref[0, :, lo:hi]                                         # (N, D) bf16
        # q @ k^T without an explicit transpose: contract the D axes directly.
        s = jax.lax.dot_general(q, k, (((1,), (1,)), ((), ())),
                                preferred_element_type=jnp.float32)    # (N, N) f32
        m = jnp.max(s, axis=-1, keepdims=True)
        p = jnp.exp(s - m)                                             # unnormalized
        denom = jnp.sum(p, axis=-1, keepdims=True)                     # (N, 1)
        o = jax.lax.dot_general(p.astype(v.dtype), v, (((1,), (0,)), ((), ())),
                                preferred_element_type=jnp.float32)    # (N, D) f32
        # Deferred softmax normalization: N*D multiplies instead of N*N.
        outs.append(o * pl.reciprocal(denom, approx=True))
    out = outs[0] if len(outs) == 1 else jnp.concatenate(outs, axis=-1)
    o_ref[0, :, :] = out.astype(o_ref.dtype)                           # one lane-dense store


def _attention_fallback_kernel(qkv_ref, o_ref, *, num_heads, head_dim):
    # Fallback when C is not 128-aligned (small models): whole (1, N, 3C) block per step.
    C = num_heads * head_dim
    outs = []
    for h in range(num_heads):
        lo = h * head_dim
        q = qkv_ref[0, :, lo:lo + head_dim]
        k = qkv_ref[0, :, C + lo:C + lo + head_dim]
        v = qkv_ref[0, :, 2 * C + lo:2 * C + lo + head_dim]
        s = jax.lax.dot_general(q, k, (((1,), (1,)), ((), ())),
                                preferred_element_type=jnp.float32)
        m = jnp.max(s, axis=-1, keepdims=True)
        p = jnp.exp(s - m)
        denom = jnp.sum(p, axis=-1, keepdims=True)
        o = jax.lax.dot_general(p.astype(v.dtype), v, (((1,), (0,)), ((), ())),
                                preferred_element_type=jnp.float32)
        outs.append(o * pl.reciprocal(denom, approx=True))
    out = outs[0] if len(outs) == 1 else jnp.concatenate(outs, axis=-1)
    o_ref[0, :, :] = out.astype(o_ref.dtype)


def pallas_attention(qkv, num_heads, *, out_dtype=jnp.bfloat16):
    B, N, threeC = qkv.shape
    C = threeC // 3
    D = C // num_heads

    if C % 128 == 0 and D <= 128 and 128 % D == 0:
        # Head-group grid: each step handles 128 lanes worth of heads for one batch elem.
        G = 128
        groups = C // G
        hpg = G // D
        kernel = functools.partial(_attention_group_kernel,
                                   heads_per_group=hpg, head_dim=D)
        grid = (B, groups)
        in_specs = [
            pl.BlockSpec((1, N, G), lambda b, g: (b, 0, g)),
            pl.BlockSpec((1, N, G), lambda b, g: (b, 0, groups + g)),
            pl.BlockSpec((1, N, G), lambda b, g: (b, 0, 2 * groups + g)),
        ]
        out_spec = pl.BlockSpec((1, N, G), lambda b, g: (b, 0, g))
        args = (qkv, qkv, qkv)
        dims = ("parallel", "parallel")
    else:
        kernel = functools.partial(_attention_fallback_kernel,
                                   num_heads=num_heads, head_dim=D)
        grid = (B,)
        in_specs = [pl.BlockSpec((1, N, threeC), lambda b: (b, 0, 0))]
        out_spec = pl.BlockSpec((1, N, C), lambda b: (b, 0, 0))
        args = (qkv,)
        dims = ("parallel",)

    return pl.pallas_call(
        kernel,
        out_shape=jax.ShapeDtypeStruct((B, N, C), out_dtype),
        grid_spec=pltpu.PrefetchScalarGridSpec(
            num_scalar_prefetch=0,
            grid=grid,
            in_specs=in_specs,
            out_specs=out_spec,
        ),
        compiler_params=pltpu.CompilerParams(
            dimension_semantics=dims,
            vmem_limit_bytes=_VMEM_LIMIT,
        ),
    )(*args)


# ----------------------------- Encoder block forward --------------------------------

def transformer_block_forward(x, params, num_heads):
    """x: (B, N, C) f32. params: output of prepare_params (bf16 weights)."""
    B, N, C = x.shape
    x2d = x.reshape(B * N, C)                                          # f32 residual stream

    # --- attention branch: x = x + proj(attn(LN1(x))) ---
    qkv = pallas_linear(x2d, params["w_qkv"],
                        ln=(params["ln1_g"], params["ln1_b"]),
                        out_dtype=jnp.bfloat16)                        # (M, 3C), LN1 fused
    y = pallas_attention(qkv.reshape(B, N, 3 * C), num_heads)          # (B, N, C) bf16
    x1 = pallas_linear(y.reshape(B * N, C), params["w_proj"],
                       bias=params["b_proj"], residual=x2d,
                       out_dtype=jnp.float32)                          # (M, C) f32

    # --- MLP branch: x = x + fc2(gelu(fc1(LN2(x)))) ---
    a = pallas_linear(x1, params["w_fc1"],
                      ln=(params["ln2_g"], params["ln2_b"]),
                      bias=params["b_fc1"], activation="gelu",
                      out_dtype=jnp.bfloat16)                          # (M, hidden), LN2 fused
    out = pallas_linear(a, params["w_fc2"],
                        bias=params["b_fc2"], residual=x1,
                        out_dtype=jnp.float32)                         # (M, C) f32
    return out.reshape(B, N, C)


# ----------------------------------- parameters -------------------------------------

def init_params(key, dim, mlp_ratio=4.0):
    hidden = int(dim * mlp_ratio)
    k = jax.random.split(key, 6)
    return {
        "ln1_g": jnp.ones((1, dim), jnp.float32),
        "ln1_b": jnp.zeros((1, dim), jnp.float32),
        # nn.Linear weights stored pre-transposed: (in_features, out_features)
        "w_qkv": jax.random.normal(k[0], (dim, 3 * dim), jnp.float32) * 0.02,
        "w_proj": jax.random.normal(k[1], (dim, dim), jnp.float32) * 0.02,
        "b_proj": jax.random.normal(k[2], (1, dim), jnp.float32) * 0.02,
        "ln2_g": jnp.ones((1, dim), jnp.float32),
        "ln2_b": jnp.zeros((1, dim), jnp.float32),
        "w_fc1": jax.random.normal(k[3], (dim, hidden), jnp.float32) * 0.02,
        "b_fc1": jax.random.normal(k[4], (1, hidden), jnp.float32) * 0.02,
        "w_fc2": jax.random.normal(k[5], (hidden, dim), jnp.float32) * 0.02,
        "b_fc2": jnp.zeros((1, dim), jnp.float32),
    }


def prepare_params(params, dim, num_heads, compute_dtype=jnp.bfloat16):
    """One-time inference prep: fold attention scale into Wq, cast weights to bf16 once."""
    head_dim = dim // num_heads
    scale = float(head_dim) ** -0.5
    w_qkv = jnp.concatenate([params["w_qkv"][:, :dim] * scale,
                             params["w_qkv"][:, dim:]], axis=1)
    out = dict(params)
    out["w_qkv"] = w_qkv.astype(compute_dtype)
    for name in ("w_proj", "w_fc1", "w_fc2"):
        out[name] = params[name].astype(compute_dtype)
    return out


# --------------------------------------- main ---------------------------------------

if __name__ == "__main__":
    B, N, C = 2, 16, 128          # dim=128 matches the Attention docstring example
    num_heads = 2                 # head_dim = 64

    key = jax.random.PRNGKey(0)
    kx, kp = jax.random.split(key)
    x = jax.random.normal(kx, (B, N, C), jnp.float32)
    params = init_params(kp, C)                            # f32 "torch-like" parameters
    iparams = prepare_params(params, C, num_heads)         # bf16 weights, scale folded (once)

    out = transformer_block_forward(x, iparams, num_heads)
    jax.block_until_ready(out)

    # Pure-JAX f32 reference for the full encoder block (exact-erf GELU).
    def ref(x):
        D = C // num_heads
        scale = float(D) ** -0.5
        x2 = x.reshape(B * N, C)

        def ln(z, g, b, eps=1e-5):
            m = jnp.mean(z, -1, keepdims=True)
            v = jnp.mean((z - m) ** 2, -1, keepdims=True)
            return (z - m) * jax.lax.rsqrt(v + eps) * g + b

        h1 = ln(x2, params["ln1_g"], params["ln1_b"])
        qkv = (h1 @ params["w_qkv"]).reshape(B, N, 3, num_heads, D)
        qkv = jnp.transpose(qkv, (2, 0, 3, 1, 4))
        q, k, v = qkv[0], qkv[1], qkv[2]
        attn = jax.nn.softmax(jnp.einsum("bhnd,bhmd->bhnm", q, k) * scale, axis=-1)
        y = jnp.einsum("bhnm,bhmd->bhnd", attn, v)
        y = jnp.transpose(y, (0, 2, 1, 3)).reshape(B * N, C)
        x1 = x2 + y @ params["w_proj"] + params["b_proj"]
        h2 = ln(x1, params["ln2_g"], params["ln2_b"])
        a = jax.nn.gelu(h2 @ params["w_fc1"] + params["b_fc1"], approximate=False)
        xo = x1 + a @ params["w_fc2"] + params["b_fc2"]
        return xo.reshape(B, N, C)

    expected = ref(x)
    max_err = jnp.max(jnp.abs(out - expected))
    assert jnp.allclose(out, expected, atol=2e-2, rtol=2e-2), (
        f"mismatch vs reference, max abs err = {max_err}")
    print("KERNEL_OK")
</pallas_src>

<mosaic_0001>
module attributes {stable_mosaic.version = 11 : i64} {
  func.func @_linear_kernel(%arg0: i32, %arg1: i32, %arg2: memref<32x128xf32, #tpu.memory_space<vmem>>, %arg3: memref<1x128xf32, #tpu.memory_space<vmem>>, %arg4: memref<1x128xf32, #tpu.memory_space<vmem>>, %arg5: memref<128x128xbf16, #tpu.memory_space<vmem>>, %arg6: memref<32x128xbf16, #tpu.memory_space<vmem>>) attributes {dimension_semantics = [#tpu.dimension_semantics<parallel>, #tpu.dimension_semantics<parallel>], iteration_bounds = array<i64: 1, 3>, scalar_prefetch = 0 : i64, scratch_operands = 0 : i64, tpu.core_type = #tpu.core_type<tc>, window_params = [{transform_indices = @transform_0, window_bounds = array<i64: 32, 128>}, {pipeline_mode = #tpu.pipeline_mode<synchronous>, transform_indices = @transform_1, window_bounds = array<i64: 1, 128>}, {pipeline_mode = #tpu.pipeline_mode<synchronous>, transform_indices = @transform_2, window_bounds = array<i64: 1, 128>}, {transform_indices = @transform_3, window_bounds = array<i64: 128, 128>}, {transform_indices = @transform_4, window_bounds = array<i64: 32, 128>}]} {
    %c0 = arith.constant 0 : index
    %c0_0 = arith.constant 0 : index
    %0 = vector.load %arg2[%c0, %c0_0] : memref<32x128xf32, #tpu.memory_space<vmem>>, vector<32x128xf32>
    %cst = arith.constant dense<0.000000e+00> : vector<32xf32>
    %1 = vector.multi_reduction <add>, %0, %cst [1] : vector<32x128xf32> to vector<32xf32>
    %2 = vector.shape_cast %1 : vector<32xf32> to vector<32x1xf32>
    %cst_1 = arith.constant 1.280000e+02 : f32
    %3 = vector.broadcast %cst_1 : f32 to vector<32x1xf32>
    %4 = arith.divf %2, %3 : vector<32x1xf32>
    %5 = vector.broadcast %4 : vector<32x1xf32> to vector<32x128xf32>
    %6 = arith.subf %0, %5 : vector<32x128xf32>
    %7 = arith.mulf %6, %6 : vector<32x128xf32>
    %cst_2 = arith.constant dense<0.000000e+00> : vector<32xf32>
    %8 = vector.multi_reduction <add>, %7, %cst_2 [1] : vector<32x128xf32> to vector<32xf32>
    %9 = vector.shape_cast %8 : vector<32xf32> to vector<32x1xf32>
    %cst_3 = arith.constant 1.280000e+02 : f32
    %10 = vector.broadcast %cst_3 : f32 to vector<32x1xf32>
    %11 = arith.divf %9, %10 : vector<32x1xf32>
    %cst_4 = arith.constant 9.99999974E-6 : f32
    %12 = vector.broadcast %cst_4 : f32 to vector<32x1xf32>
    %13 = arith.addf %11, %12 : vector<32x1xf32>
    %14 = math.rsqrt %13 : vector<32x1xf32>
    %15 = vector.broadcast %14 : vector<32x1xf32> to vector<32x128xf32>
    %16 = arith.mulf %6, %15 : vector<32x128xf32>
    %c0_5 = arith.constant 0 : index
    %c0_6 = arith.constant 0 : index
    %17 = vector.load %arg3[%c0_5, %c0_6] : memref<1x128xf32, #tpu.memory_space<vmem>>, vector<1x128xf32>
    %18 = vector.broadcast %17 : vector<1x128xf32> to vector<32x128xf32>
    %19 = arith.mulf %16, %18 : vector<32x128xf32>
    %c0_7 = arith.constant 0 : index
    %c0_8 = arith.constant 0 : index
    %20 = vector.load %arg4[%c0_7, %c0_8] : memref<1x128xf32, #tpu.memory_space<vmem>>, vector<1x128xf32>
    %21 = vector.broadcast %20 : vector<1x128xf32> to vector<32x128xf32>
    %22 = arith.addf %19, %21 : vector<32x128xf32>
    %23 = arith.truncf %22 : vector<32x128xf32> to vector<32x128xbf16>
    %c0_9 = arith.constant 0 : index
    %c0_10 = arith.constant 0 : index
    %24 = vector.load %arg5[%c0_9, %c0_10] : memref<128x128xbf16, #tpu.memory_space<vmem>>, vector<128x128xbf16>
    %cst_11 = arith.constant dense<0.000000e+00> : vector<32x128xf32>
    %25 = tpu.matmul %23, %24, %cst_11 {dimension_numbers = #tpu.dot_dimension_numbers<[1], [0], [0], [1], [0, 0, 1, 1], [], []>} : vector<32x128xbf16>, vector<128x128xbf16>, vector<32x128xf32> -> vector<32x128xf32>
    %26 = arith.truncf %25 : vector<32x128xf32> to vector<32x128xbf16>
    %c0_12 = arith.constant 0 : index
    %c0_13 = arith.constant 0 : index
    %27 = vector.load %arg6[%c0_12, %c0_13] : memref<32x128xbf16, #tpu.memory_space<vmem>>, vector<32x128xbf16>
    tpu.vector_store %arg6[%c0_12, %c0_13], %26 {strides = array<i32>} : memref<32x128xbf16, #tpu.memory_space<vmem>>, vector<32x128xbf16>,
    return
  }
  func.func @transform_0(%arg0: i32, %arg1: i32) -> (i32, i32) {
    %c0_i32 = arith.constant 0 : i32
    %c0_i32_0 = arith.constant 0 : i32
    return %arg0, %c0_i32 : i32, i32
  }
  func.func @transform_1(%arg0: i32, %arg1: i32) -> (i32, i32) {
    %c0_i32 = arith.constant 0 : i32
    %c0_i32_0 = arith.constant 0 : i32
    %c0_i32_1 = arith.constant 0 : i32
    return %c0_i32, %c0_i32_0 : i32, i32
  }
  func.func @transform_2(%arg0: i32, %arg1: i32) -> (i32, i32) {
    %c0_i32 = arith.constant 0 : i32
    %c0_i32_0 = arith.constant 0 : i32
    %c0_i32_1 = arith.constant 0 : i32
    return %c0_i32, %c0_i32_0 : i32, i32
  }
  func.func @transform_3(%arg0: i32, %arg1: i32) -> (i32, i32) {
    %c0_i32 = arith.constant 0 : i32
    %c0_i32_0 = arith.constant 0 : i32
    return %c0_i32, %arg1 : i32, i32
  }
  func.func @transform_4(%arg0: i32, %arg1: i32) -> (i32, i32) {
    %c0_i32 = arith.constant 0 : i32
    return %arg0, %arg1 : i32, i32
  }
}

</mosaic_0001>

<bundles_post_ra>
// kernel: tpu_custom_call.1
= control target key start
LH: loop header
LB: loop body
LE: loop exit
PB: predicated region body
PF: predicated region fallthrough
CT: control target
= control target key end

     0   :  { %s1179_s0 = inlined_call_operand.hbm [shape: f32[32,128], index: 0, kind: input, shape index: {}]   ;;  %s1180_s1 = inlined_call_operand.hbm [shape: f32[1,128], index: 1, kind: input, shape index: {}]   ;;  %s1181_s2 = inlined_call_operand.vmem [shape: f32[1,128], index: 2, kind: input, shape index: {}]   ;;  %s1182_s3 = inlined_call_operand.hbm [shape: bf16[128,384], index: 3, kind: input, shape index: {}]   ;;  %s1183_s4 = inlined_call_operand.hbm [shape: bf16[32,384], index: 4, kind: output, shape index: {}]  }
   0x1   :  { %1186 = sst [smem:[#allocation15_spill]] %s1179_s0 }
   0x2   :  { %1187 = sst [smem:[#allocation16_spill]] %s1180_s1 }
   0x3   :  { %9 = vsyncpa [#allocation3], 0 }
   0x4   :  { %10 = vsyncpa [#allocation6], 0 }
   0x5   :  { %11 = vsyncpa [#allocation4], 0 }
   0x6   :  { %13 = vsyncpa [#allocation4 + $0x1], 0  ;;  %s990_s15 = smov 0   ;;  %s992_s16 = smov 0  }
   0x7   :  { %s994_s17 = smov 0   ;;  %s996_s18 = smov 0  }
   0x8   :  { %s998_s19 = smov 0   ;;  %s1000_s20 = smov 0  }
   0x9 LB: > { %1188 = sst [smem:[#allocation13_spill]] %s932_s15  ;;  %s1021_s21 = sadd.s32 4294967295, %s952_s20   ;;  %s952_s20 = sphi %s1000_s20, %s19_s20   ;;  %s948_s19 = sphi %s998_s19, %s1204_s19   ;;  %s944_s18 = sphi %s996_s18, %s1203_s18   ;;  %s940_s17 = sphi %s994_s17, %s1202_s17   ;;  %s936_s16 = sphi %s992_s16, %s1201_s16   ;;  %s932_s15 = sphi %s990_s15, %s1200_s15  }
   0xa   : > { %s593_s22 = sadd.s32 4294967294, %s952_s20   ;;  %p113_p0 = scmp.ne.s32.totalorder %s940_s17, %s936_s16 }
   0xb   : > { %p114_p1 = scmp.eq.s32.totalorder %s952_s20, 0  ;;  %p119_p2 = scmp.ne.s32.totalorder %s936_s16, %s932_s15 }
   0xc   : > { %p120_p3 = scmp.eq.s32.totalorder %s1021_s21, 0  ;;  %p145_p5 = scmp.eq.s32.totalorder %s1021_s21, 2 }
   0xd   : > { %p1030_p4 = por %p114_p1, %p113_p0  ;;  %p151_p7 = scmp.eq.s32.totalorder %s593_s22, 2 }
   0xe   : > { %p1037_p6 = por %p120_p3, %p119_p2  ;;  %p1041_p8 = por %p145_p5, %p113_p0 }
   0xf   : > { %p594_p9 = scmp.ge.s32.totalorder %s952_s20, 1  ;;  %p1046_p10 = por %p151_p7, %p119_p2 }
  0x10   : > { %p158_p11 = scmp.lt.s32.totalorder %s952_s20, 4  ;;  %s1194_s0 = sld [smem:[#allocation15_spill]] }
  0x11   : > { %s1192_s26 = scalar_select %p1046_p10, 1, 0 }
  0x12   : > { %p1054_p12 = pnand %p594_p9, %p158_p11  ;;  %s954_s5 = smov [#allocation2]  }
  0x13   : > { %1193 = sst [smem:[#allocation14_spill]] %s1192_s26  ;;  %s174_s6 = sshll.u32 %s954_s5, 4  ;;  %s175_s6 = int_to_ptr.vmem [resolvable:$true] %s174_s6 }
  0x14   : > { %p680_p13 = pneg %p1054_p12  ;;  %p697_p1 = scmp.lt.s32.totalorder %s952_s20, 3 }
  0x15   : > { %s1196_s1 = sld [smem:[#allocation16_spill]]  ;;  %s955_s10 = smov 128  }
  0x16   : > { %s172_s29 = sshll.u32 %s1194_s0, 4  ;;  %p681_p0 = pnand %p680_p13, %p120_p3  ;;  %s173_s29 = int_to_ptr.hbm [resolvable:$true] %s172_s29 }
  0x17   : > { %s956_s11 = smov 8   ;;  %p1068_p2 = pnand %p697_p1, %p1030_p4 }
  0x18   : > { %683 = dma.hbm_to_vmem [thread:$0]  (!%p681_p0), %s173_s29, 512, %s175_s6, [#allocation3], %s955_s10, %s955_s10, %s956_s11  }
  0x19   : > { %s957_s13 = smov [#allocation5]   ;;  %s106_s22 = sadd.s32 1, %s940_s17 }
  0x1a   : > { %s189_s14 = sshll.u32 %s957_s13, 4  ;;  %s28_s27 = sadd.s32 1, %s948_s19  ;;  %s190_s14 = int_to_ptr.vmem [resolvable:$true] %s189_s14 }
  0x1b   : > { %s187_s9 = sshll.u32 %s1196_s1, 4  ;;  %s203_s28 = sand.u32 1, %s952_s20   ;;  %s188_s9 = int_to_ptr.hbm [resolvable:$true] %s187_s9 }
  0x1c   : > { %686 = dma.hbm_to_vmem [thread:$0]  (!%p681_p0), %s188_s9, 16, %s190_s14, [#allocation6]  }
  0x1d   : > { %p29_p5 = scmp.ge.s32.totalorder %s28_s27, 3  ;;  %s205_s5 = sand.u32 1, %s940_s17  }
  0x1e   : > { %s599_s7 = sshll.u32 %s948_s19, 2  ;;  %s598_s23 = sshll.u32 %s205_s5, 6 }
  0x1f   : > { %s1206_s27 = smov (%p29_p5, %s28_s27), 0  ;;  %s211_s8 = scalar_lea.hbm %s1182_s3, %s599_s7 }
  0x20   : > { %s103_s10 = ssub.s32 %s948_s19, %s1206_s27  ;;  %s212_s11 = sshll.u32 %s211_s8, 4  ;;  %s213_s11 = int_to_ptr.hbm [resolvable:$true] %s212_s11 }
  0x21   : > { %p104_p4 = scmp.eq.s32.totalorder %s103_s10, 0  ;;  %s207_s9 = scalar_lea.vmem [#allocation7], %s598_s23 }
  0x22   : > { %s214_s13 = sshll.u32 %s207_s9, 4  ;;  %s204_s0 = scalar_lea.sflag [#allocation3], %s203_s28  ;;  %s215_s13 = int_to_ptr.vmem [resolvable:$true] %s214_s13 }
  0x23   : > { %s1085_s14 = scalar_select %p104_p4, %s940_s17, %s106_s22  }
  0x24   : > { %s958_s1 = smov 192   ;;  %s959_s26 = smov 64  }
  0x25   : > { %s960_s15 = smov 4   ;;  %226 = sbr.rel (%p1054_p12) target bundleno = 468 (0x1d4), region = 36 }
  0x26   : > { %690 = dma.hbm_to_vmem [thread:$0]  (!%p1068_p2), %s213_s11, 1024, %s215_s13, %s204_s0, %s958_s1, %s959_s26, %s960_s15  }
  0x2a   : > { %915 = dma.done.wait (%p120_p3), [#allocation3], 512  }
  0x2b   : > { %917 = vsyncadd (%p120_p3), [#allocation3], 4294966784 }
  0x2c   : > { %919 = dma.done.wait (%p120_p3), [#allocation6], 16  }
  0x2d   : > { %921 = vsyncadd (%p120_p3), [#allocation6], 4294967280  ;;  %s238_s12 = sand.u32 1, %s1021_s21   ;;  %s1101_s0 = sand.u32 1, %s936_s16  }
  0x2e   : > { %s603_s1 = sshll.u32 %s1101_s0, 6  ;;  %s239_s15 = scalar_lea.sflag [#allocation3], %s238_s12 }
  0x2f   : > { %s1104_s26 = scalar_lea.vmem [#allocation7], %s603_s1 }
  0x30   : > { %923 = dma.done.wait (%p1037_p6), %s239_s15, 1024  }
  0x31   : > { %925 = vsyncadd (%p1037_p6), %s239_s15, 4294966272  ;;  %v272_v0 = vld [vmem:[#allocation2 + $0x10] sm:$0xff]  ;;  %v270_v1 = vld [vmem:[#allocation2] sm:$0xff]  ;;  %v961_v4 = vmov 128.0   ;;  %s604_s30 = sshll.u32 %s1101_s0, 4  ;;  %s638_s22 = sshll.u32 %s944_s18, 2 }
  0x32   : > { %278 = vadd.xlane.f32.xlu1 %v272_v0  ;;  %274 = vadd.xlane.f32.xlu0 %v270_v1  ;;  %v273_v2 = vld [vmem:[#allocation2 + $0x18] sm:$0xff]  ;;  %v271_v3 = vld [vmem:[#allocation2 + $0x8] sm:$0xff]  ;;  %762 = vrcp.f32 %v961_v4  ;;  %s484_s7 = scalar_lea.hbm %s1183_s4, %s638_s22  ;;  %s267_s23 = scalar_lea.vmem [#allocation8], %s604_s30 }
  0x33   : > { %v648_v27 = vld [vmem:[%s1104_s26 + $0x38] sm:$0xff]  ;;  %v647_v28 = vld [vmem:[%s1104_s26 + $0x30] sm:$0xff]  ;;  %v646_v29 = vld [vmem:[%s1104_s26 + $0x28] sm:$0xff]  ;;  %s485_s29 = sshll.u32 %s267_s23, 4  ;;  %s487_s6 = sshll.u32 %s484_s7, 4  ;;  %s486_s29 = int_to_ptr.vmem [resolvable:$true] %s485_s29  ;;  %s488_s6 = int_to_ptr.hbm [resolvable:$true] %s487_s6 }
  0x34   : > { %443 = vmatpush.bf16.msra.mxu0 %v648_v27  ;;  %660 = vmatpush.bf16.msra.mxu1 %v648_v27  ;;  %v645_v30 = vld [vmem:[%s1104_s26 + $0x20] sm:$0xff]  ;;  %v644_v31 = vld [vmem:[%s1104_s26 + $0x18] sm:$0xff]  ;;  %v643_v32 = vld [vmem:[%s1104_s26 + $0x10] sm:$0xff]  ;;  %s471_s8 = scalar_lea.sflag [#allocation4], %s1101_s0  ;;  %s876_s10 = sshra.s32 %s488_s6, 4  ;;  %s877_s10 = int_to_ptr.hbm [resolvable:$true] %s876_s10 }
  0x35   : > { %v642_v33 = vld [vmem:[%s1104_s26 + $0x8] sm:$0xff]  ;;  %v641_v38 = vld [vmem:[%s1104_s26] sm:$0xff]  ;;  %s878_s18 = scalar_lea.hbm %s877_s10, 16  ;;  %s882_s13 = scalar_lea.hbm %s1183_s4, 48 }
  0x36   : > { %p879_p3 = scmp.ne.s32.totalorder %s877_s10, %s878_s18  ;;  %p883_p9 = scmp.lt.s32.totalorder %s877_s10, %s1183_s4 }
  0x37   : > { %p884_p11 = scmp.lt.s32.totalorder %s882_s13, %s878_s18 }
  0x38   : > { %v763_v5 = vpop.eup %762  ;;  %444 = vmatpush.bf16.msra.mxu0 %v647_v28  ;;  %661 = vmatpush.bf16.msra.mxu1 %v647_v28  ;;  %p880_p6 = pnand %p879_p3, %p1041_p8 }
  0x39   : > { %v283_v6 = vmul.f32 128.0, %v763_v5  ;;  %vm287_vm0 = vweird.f32 %v763_v5  ;;  %p885_p12 = por %p884_p11, %p883_p9 }
  0x3a   : > { %280 = vadd.xlane.f32.xlu1 %v273_v2  ;;  %276 = vadd.xlane.f32.xlu0 %v271_v3  ;;  %p881_p7 = pneg %p880_p6 }
  0x3b   : > { %v284_v7 = vsub.f32 1.0, %v283_v6 }
  0x3c   : > { %445 = vmatpush.bf16.msra.mxu0 %v646_v29  ;;  %662 = vmatpush.bf16.msra.mxu1 %v646_v29  ;;  %p886_p13 = pnand %p885_p12, %p881_p7 }
  0x3d   : > { %v285_v8 = vmul.f32 %v763_v5, %v284_v7  ;;  %v760_v7 = vld [vmem:[#allocation5] ss:$0 sm:$0xff] }
  0x3f   : > { %v286_v9 = vadd.f32 %v763_v5, %v285_v8 }
  0x40   : > { %446 = vmatpush.bf16.msra.mxu0 %v645_v30  ;;  %663 = vmatpush.bf16.msra.mxu1 %v645_v30 }
  0x41   : > { %v288_v10 = vsel %vm287_vm0, %v763_v5, %v286_v9 }
  0x44   : > { %447 = vmatpush.bf16.msra.mxu0 %v644_v31  ;;  %664 = vmatpush.bf16.msra.mxu1 %v644_v31 }
  0x48   : > { %448 = vmatpush.bf16.msra.mxu0 %v643_v32  ;;  %665 = vmatpush.bf16.msra.mxu1 %v643_v32 }
  0x4c   : > { %449 = vmatpush.bf16.msra.mxu0 %v642_v33  ;;  %666 = vmatpush.bf16.msra.mxu1 %v642_v33 }
  0x50   : > { %450 = vmatpush.bf16.msra.mxu0 %v641_v38  ;;  %667 = vmatpush.bf16.msra.mxu1 %v641_v38 }
  0xa5   : > { %v279_v11 = vpop.xlane.xlu1 %278  ;;  %v275_v12 = vpop.xlane.xlu0 %274 }
  0xa6   : > { %v291_v13 = vmul.f32 %v288_v10, %v279_v11  ;;  %v289_v14 = vmul.f32 %v288_v10, %v275_v12 }
  0xa8   : > { %v1110_v15 = vsub.f32 %v272_v0, %v291_v13  ;;  %v1112_v16 = vsub.f32 %v270_v1, %v289_v14  ;;  %v761_v14 = vld [vmem:[%s1181_s2] ss:$0 sm:$0xff] }
  0xaa   : > { %v299_v17 = vmul.f32 %v1110_v15, %v1110_v15  ;;  %v297_v18 = vmul.f32 %v1112_v16, %v1112_v16 }
  0xac   : > { %305 = vadd.xlane.f32.xlu0 %v299_v17  ;;  %301 = vadd.xlane.f32.xlu2 %v297_v18 }
  0xad   : > { %v281_v19 = vpop.xlane.xlu1 %280  ;;  %v277_v20 = vpop.xlane.xlu0 %276 }
  0xae   : > { %v292_v21 = vmul.f32 %v288_v10, %v281_v19  ;;  %v290_v22 = vmul.f32 %v288_v10, %v277_v20 }
  0xb0   : > { %v1118_v23 = vsub.f32 %v273_v2, %v292_v21  ;;  %v1120_v24 = vsub.f32 %v271_v3, %v290_v22 }
  0xb2   : > { %v300_v25 = vmul.f32 %v1118_v23, %v1118_v23  ;;  %v298_v26 = vmul.f32 %v1120_v24, %v1120_v24 }
  0xb4   : > { %307 = vadd.xlane.f32.xlu1 %v300_v25  ;;  %303 = vadd.xlane.f32.xlu2 %v298_v26 }
 0x11f   : > { %v302_v34 = vpop.xlane.xlu2 %301  ;;  %v306_v35 = vpop.xlane.xlu0 %305 }
 0x120   : > { %v309_v36 = vmul.f32 %v302_v34, %v288_v10  ;;  %v311_v37 = vmul.f32 %v306_v35, %v288_v10 }
 0x122   : > { %v313_v39 = vadd.f32 1e-05, %v309_v36  ;;  %v315_v40 = vadd.f32 1e-05, %v311_v37 }
 0x124   : > { %764 = vrsqrt.f32 %v313_v39  ;;  %vm343_vm3 = vweird.f32 %v315_v40  ;;  %vm323_vm4 = vweird.f32 %v313_v39 }
 0x125   : > { %766 = vrsqrt.f32 %v315_v40 }
 0x127   : > { %v308_v41 = vpop.xlane.xlu1 %307  ;;  %v304_v42 = vpop.xlane.xlu2 %303 }
 0x128   : > { %v312_v43 = vmul.f32 %v308_v41, %v288_v10  ;;  %v310_v44 = vmul.f32 %v304_v42, %v288_v10 }
 0x12a   : > { %v765_v45 = vpop.eup %764  ;;  %v316_v46 = vadd.f32 1e-05, %v312_v43  ;;  %v314_v47 = vadd.f32 1e-05, %v310_v44 }
 0x12b   : > { %v767_v48 = vpop.eup %766  ;;  %v318_v49 = vmul.f32 %v765_v45, %v313_v39  ;;  %vm324_vm2 = vweird.f32 %v765_v45 }
 0x12c   : > { %v338_v50 = vmul.f32 %v767_v48, %v315_v40  ;;  %768 = vrsqrt.f32 %v316_v46  ;;  %vm344_vm1 = vweird.f32 %v767_v48  ;;  %vm325_vm6 = vmor %vm323_vm4, %vm324_vm2  ;;  %vm353_vm9 = vweird.f32 %v316_v46 }
 0x12d   : > { %v319_v51 = vmul.f32 %v765_v45, %v318_v49  ;;  %770 = vrsqrt.f32 %v314_v47  ;;  %vm345_vm5 = vmor %vm343_vm3, %vm344_vm1  ;;  %vm333_vm11 = vweird.f32 %v314_v47 }
 0x12e   : > { %v339_v52 = vmul.f32 %v767_v48, %v338_v50 }
 0x12f   : > { %v320_v53 = vmul.f32 0.5, %v319_v51 }
 0x130   : > { %v340_v54 = vmul.f32 0.5, %v339_v52 }
 0x131   : > { %v321_v55 = vsub.f32 1.5, %v320_v53 }
 0x132   : > { %v769_v56 = vpop.eup %768  ;;  %v341_v57 = vsub.f32 1.5, %v340_v54 }
 0x133   : > { %v771_v58 = vpop.eup %770  ;;  %v348_v59 = vmul.f32 %v769_v56, %v316_v46  ;;  %v322_v60 = vmul.f32 %v765_v45, %v321_v55  ;;  %vm354_vm7 = vweird.f32 %v769_v56 }
 0x134   : > { %v342_v61 = vmul.f32 %v767_v48, %v341_v57  ;;  %v328_v62 = vmul.f32 %v771_v58, %v314_v47  ;;  %vm334_vm8 = vweird.f32 %v771_v58  ;;  %vm355_vm10 = vmor %vm353_vm9, %vm354_vm7 }
 0x135   : > { %v349_v63 = vmul.f32 %v769_v56, %v348_v59  ;;  %v326_v4 = vsel %vm325_vm6, %v765_v45, %v322_v60  ;;  %vm335_vm12 = vmor %vm333_vm11, %vm334_vm8 }
 0x136   : > { %v329_v0 = vmul.f32 %v771_v58, %v328_v62  ;;  %v346_v2 = vsel %vm345_vm5, %v767_v48, %v342_v61  ;;  %v357_v10 = vmul.f32 %v326_v4, %v1112_v16 }
 0x137   : > { %v350_v1 = vmul.f32 0.5, %v349_v63  ;;  %v359_v8 = vmul.f32 %v346_v2, %v1110_v15 }
 0x138   : > { %v330_v3 = vmul.f32 0.5, %v329_v0  ;;  %v365_v19 = vmul.f32 %v760_v7, %v357_v10 }
 0x139   : > { %v351_v5 = vsub.f32 1.5, %v350_v1  ;;  %v367_v18 = vmul.f32 %v760_v7, %v359_v8 }
 0x13a   : > { %v331_v6 = vsub.f32 1.5, %v330_v3  ;;  %v373_v25 = vadd.f32 %v761_v14, %v365_v19 }
 0x13b   : > { %v352_v9 = vmul.f32 %v769_v56, %v351_v5  ;;  %v375_v21 = vadd.f32 %v761_v14, %v367_v18 }
 0x13c   : > { %v332_v11 = vmul.f32 %v771_v58, %v331_v6 }
 0x13d   : > { %v356_v12 = vsel %vm355_vm10, %v769_v56, %v352_v9 }
 0x13e   : > { %v336_v13 = vsel %vm335_vm12, %v771_v58, %v332_v11  ;;  %v360_v17 = vmul.f32 %v356_v12, %v1118_v23 }
 0x13f   : > { %v358_v15 = vmul.f32 %v336_v13, %v1120_v24 }
 0x140   : > { %v368_v20 = vmul.f32 %v760_v7, %v360_v17 }
 0x141   : > { %v366_v16 = vmul.f32 %v760_v7, %v358_v15 }
 0x142   : > { %v376_v22 = vadd.f32 %v761_v14, %v368_v20 }
 0x143   : > { %v374_v26 = vadd.f32 %v761_v14, %v366_v16 }
 0x144   : > { %v378_v27 = vpack.c.bf16 %v376_v22, %v375_v21 }
 0x145   : > { %v377_v28 = vpack.c.bf16 %v374_v26, %v373_v25 }
 0x146   : > { %456 = vmatmul.bf16.vlgmr.msra.gmra.mxu1 %v378_v27 }
 0x147   : > { %451 = vmatmul.bf16.vlgmr.msra.gmra.mxu0 %v377_v28 }
 0x1c3   : > { %v457_v29 = vpop.f32.mrf.mxu1 }
 0x1c4   : > { %v452_v23 = vpop.f32.mrf.mxu0 }
 0x1cb   : > { %v459_v24 = vpop.f32.mrf.mxu1 }
 0x1cc   : > { %v454_v30 = vpop.f32.mrf.mxu0  ;;  %v657_v31 = vpack.c.bf16 %v459_v24, %v457_v29 }
 0x1cd   : > { %v652_v32 = vpack.c.bf16 %v454_v30, %v452_v23 }
 0x1ce   : > { %659 = vst [vmem:[%s267_s23 + $0x8] sm:$0xff] %v657_v31  }
 0x1cf   : > { %653 = vst [vmem:[%s267_s23] sm:$0xff] %v652_v32  }
 0x1d0   : > { %889 = shalt.err (!%p886_p13)
}
 0x1d1   : > { %s962_s0 = smov 64   ;;  %s963_s15 = smov 192  }
 0x1d2   : > { %s964_s26 = smov 4  }
 0x1d3   : > { %678 = dma.vmem_to_hbm [thread:$0]  (%p1041_p8), %s486_s29, 256, %s488_s6, %s471_s8, %s962_s0, %s963_s15, %s964_s26  }
 0x1d4 PF: > { %s1198_s21 = sld [smem:[#allocation13_spill]]  ;;  %p700_p0 = scmp.ge.s32.totalorder %s952_s20, 2 }
 0x1d6   : > { %p692_p1 = pnand %p700_p0, %p1046_p10 }
 0x1d8   : > { %p693_p2 = pneg %p692_p1 }
 0x1da   : > { %s502_s30 = sand.u32 1, %s1198_s21  }
 0x1db   : > { %s503_s22 = scalar_lea.sflag [#allocation4], %s502_s30 }
 0x1dc   : > { %927 = dma.done.wait (%p693_p2), %s503_s22, 256  }
 0x1dd   : > { %929 = vsyncadd (%p693_p2), %s503_s22, 4294967040  ;;  %s19_s20 = sadd.s32 1, %s952_s20   ;;  %s1200_s15 = smov %s936_s16 }
 0x1de   : > { %p16_p5 = scmp.ge.s32.totalorder %s19_s20, 5   ;;  %s1201_s16 = smov %s940_s17 }
 0x1df   : > { %s1202_s17 = smov %s1085_s14  ;;  %s1203_s18 = smov %s948_s19 }
 0x1e0   : > { %s1204_s19 = smov %s1206_s27  ;;  %18 = sbr.rel (!%p16_p5) target bundleno = 9 (0x9), region = 89 }
 0x1e5   :  { %509 = vsyncpa [#allocation3], 1 }
 0x1e6   :  { %511 = vsyncpa [#allocation3 + $0x1], 1 }
 0x1e7   :  { %512 = vsyncpa [#allocation6], 1 }
 0x1e8   :  { %513 = vsyncpa [#allocation4], 1 }
 0x1e9   :  { %515 = vsyncpa [#allocation4 + $0x1], 1 }

</bundles_post_ra>
